<compile_context>
chip_gen: v5e
topology: v5e:2x2
jax: 0.10.0
libtpu: 0.0.40
codegen_flags: <defaults>
</compile_context>

<pallas_src>
import functools

import jax
import jax.numpy as jnp
from jax.experimental import pallas as pl
from jax.experimental.pallas import tpu as pltpu


_PACK = 2                      # batch rows packed per lane row (lane-dense layout)
_TILE_VMEM_BUDGET = 24 << 20   # double-buffered x+out tile budget (fits v7x's 32 MiB scoped)


def _lambda_fused_kernel(x_ref, w_ref, b_ref, out_ref, *, zdims):
    """x: [TBp, PACK*H], w: [PACK*H, PACK*2Z], b: [1, PACK*2Z], out: [TBp, PACK*2Z].

    Each packed output row holds PACK slots of [mean_r | softplus(logvar_r)],
    one 2Z-wide slot per original batch row.
    """
    x = x_ref[...]
    # Single fused GEMM (both linears, both packed rows) + one broadcast bias add.
    pre = jnp.dot(x, w_ref[...], preferred_element_type=jnp.float32) + b_ref[...]

    # Softplus (PyTorch default beta=1, threshold=20); clamp before exp so the
    # unselected branch never overflows.
    sp = jnp.where(pre > 20.0, pre, jnp.log1p(jnp.exp(jnp.minimum(pre, 20.0))))

    # Within each 2Z-wide packed slot, columns [0, Z) are the mean (identity)
    # and [Z, 2Z) are the logvar (softplus). Lane mask -> no lane shuffles and
    # one lane-dense (unmasked) store of the whole slab.
    col = jax.lax.broadcasted_iota(jnp.int32, pre.shape, dimension=1)
    out = jnp.where((col % (2 * zdims)) >= zdims, sp, pre)
    out_ref[...] = out.astype(out_ref.dtype)


def prepare_lambda_params(w_mean, b_mean, w_logvar, b_logvar, *, dtype=jnp.float32):
    """Build the packed weights ONCE (hoisted out of the per-call path).

    w_*: [hid_dim, ZDIMS] (transposed vs PyTorch's [out, in]); b_*: [ZDIMS].
    Returns:
      w_blk: [PACK*H, PACK*2Z] block-diagonal [[W_cat, 0], [0, W_cat]], W_cat=[W_mean|W_logvar]
      b_blk: [1,      PACK*2Z] = [b_cat | b_cat] (kept f32)
    """
    H, Z = w_mean.shape
    w_cat = jnp.concatenate([w_mean, w_logvar], axis=1)            # [H, 2Z]
    b_cat = jnp.concatenate([b_mean, b_logvar])                    # [2Z]
    zeros = jnp.zeros_like(w_cat)
    blocks = [[w_cat if i == j else zeros for j in range(_PACK)] for i in range(_PACK)]
    w_blk = jnp.block(blocks).astype(dtype)                        # [PACK*H, PACK*2Z]
    b_blk = jnp.tile(b_cat, _PACK).reshape(1, _PACK * 2 * Z).astype(jnp.float32)
    return w_blk, b_blk


def lambda_legacy_forward(cell_output, w_blk, b_blk, *, block_b=8192,
                          return_fused=False):
    """Eval-mode Lambda_LEGACY forward.

    cell_output: [B, hid_dim]; (w_blk, b_blk) from prepare_lambda_params().
    Returns (latent_mean, latent_mean, latent_logvar), or the fused [B, 2Z]
    slab if return_fused=True (lets the consumer slice lazily).
    """
    B, H = cell_output.shape
    WP = w_blk.shape[1]                 # PACK * 2Z
    Z = WP // (2 * _PACK)
    assert w_blk.shape[0] == _PACK * H, "w_blk does not match cell_output hid_dim"

    # Stream activations in the weight dtype (e.g. bf16); accumulate/output f32.
    x = cell_output.astype(w_blk.dtype)

    # Lane-dense packing: PACK batch rows per lane row (row-major reshape = free).
    pad = (-B) % _PACK
    if pad:
        x = jnp.pad(x, ((0, pad), (0, 0)))
    Bp = (B + pad) // _PACK
    xp = x.reshape(Bp, _PACK * H)

    # --- batch-tile sizing ---------------------------------------------------
    x_item = jnp.dtype(x.dtype).itemsize
    bytes_per_packed_row = _PACK * H * x_item + WP * 4          # x row + f32 out row
    max_tbp_vmem = max(8, _TILE_VMEM_BUDGET // (2 * bytes_per_packed_row))

    tbp = min(max(1, block_b // _PACK), max_tbp_vmem)
    if Bp > 16:
        # Keep >= 2 grid steps so ("parallel",) can shard across v7x's 2 TCs.
        tbp = min(tbp, pl.cdiv(Bp, 2))
    if tbp >= Bp:
        tbp = Bp                          # single block == full array
    else:
        tbp = max(8, (tbp // 8) * 8)      # sublane-aligned streamed tiles
    grid = (pl.cdiv(Bp, tbp),)

    # Explicit VMEM limit only when the double-buffered tiles would exceed the
    # smallest scoped default (v5e: 16 MiB).
    weight_bytes = w_blk.size * jnp.dtype(w_blk.dtype).itemsize + b_blk.size * 4
    vmem_needed = 2 * tbp * bytes_per_packed_row + 2 * weight_bytes + (2 << 20)
    cp_kwargs = dict(dimension_semantics=("parallel",))
    if vmem_needed > (16 << 20):
        cp_kwargs["vmem_limit_bytes"] = int(min(vmem_needed, 48 << 20))

    fused_p = pl.pallas_call(
        functools.partial(_lambda_fused_kernel, zdims=Z),
        out_shape=jax.ShapeDtypeStruct((Bp, WP), jnp.float32),
        grid=grid,
        in_specs=[
            pl.BlockSpec((tbp, _PACK * H), lambda i: (i, 0)),   # streamed activations
            pl.BlockSpec((_PACK * H, WP), lambda i: (0, 0)),    # VMEM-resident weights
            pl.BlockSpec((1, WP), lambda i: (0, 0)),            # VMEM-resident bias
        ],
        out_specs=pl.BlockSpec((tbp, WP), lambda i: (i, 0)),
        compiler_params=pltpu.CompilerParams(**cp_kwargs),
    )(xp, w_blk, b_blk)

    # Free row-major un-pack back to [B, 2Z]; drop the padded tail row if any.
    fused = fused_p.reshape(Bp * _PACK, 2 * Z)[:B]
    if return_fused:
        return fused                       # [B, 2Z] = [mean | logvar]
    mean = fused[:, :Z]
    logvar = fused[:, Z:]
    # eval-mode return: (latent_mean, latent_mean, latent_logvar)
    return mean, mean, logvar


def _reference(cell_output, w_mean, b_mean, w_logvar, b_logvar):
    mean = cell_output @ w_mean + b_mean
    pre = cell_output @ w_logvar + b_logvar
    logvar = jnp.where(pre > 20.0, pre, jnp.log1p(jnp.exp(jnp.minimum(pre, 20.0))))
    return mean, mean, logvar


if __name__ == "__main__":
    # Module config: ZDIMS=32, hidden_size_layer_1=16, hidden_size_layer_2=16
    # => hid_dim = 16*2 + 16*2 = 64
    ZDIMS = 32
    hidden_size_layer_1 = 16
    hidden_size_layer_2 = 16
    hid_dim = hidden_size_layer_1 * 2 + hidden_size_layer_2 * 2  # 64

    key = jax.random.PRNGKey(0)
    k_x, k_wm, k_bm, k_wl, k_bl = jax.random.split(key, 5)

    # PyTorch Linear stores [out, in]; kept pre-transposed here as [in, out].
    w_mean = jax.random.normal(k_wm, (hid_dim, ZDIMS), dtype=jnp.float32) * 0.05
    b_mean = jax.random.normal(k_bm, (ZDIMS,), dtype=jnp.float32) * 0.05
    w_logvar = jax.random.normal(k_wl, (hid_dim, ZDIMS), dtype=jnp.float32) * 0.05
    b_logvar = jax.random.normal(k_bl, (ZDIMS,), dtype=jnp.float32) * 0.05

    # Packed params built once (hoisted out of the per-call / per-timestep path).
    w_blk_f32, b_blk = prepare_lambda_params(w_mean, b_mean, w_logvar, b_logvar)
    w_blk_bf16, _ = prepare_lambda_params(w_mean, b_mean, w_logvar, b_logvar,
                                          dtype=jnp.bfloat16)

    # 1) Small batch, single block, exact f32 path.
    x_small = jax.random.normal(k_x, (8, hid_dim), dtype=jnp.float32)
    out = jax.block_until_ready(lambda_legacy_forward(x_small, w_blk_f32, b_blk))
    ref = _reference(x_small, w_mean, b_mean, w_logvar, b_logvar)
    for o, r in zip(out, ref):
        assert jnp.allclose(o, r, atol=1e-5, rtol=1e-5), "f32 small-batch mismatch"

    # 2) Odd batch (exercises the pad/tail path), f32.
    x_odd = jax.random.normal(k_x, (7, hid_dim), dtype=jnp.float32)
    out = jax.block_until_ready(lambda_legacy_forward(x_odd, w_blk_f32, b_blk))
    ref = _reference(x_odd, w_mean, b_mean, w_logvar, b_logvar)
    for o, r in zip(out, ref):
        assert o.shape == r.shape, "f32 odd-batch shape mismatch"
        assert jnp.allclose(o, r, atol=1e-5, rtol=1e-5), "f32 odd-batch mismatch"

    # 3) Multi-tile grid (>= 2 parallel steps) with bf16-streamed activations.
    x_big = jax.random.normal(k_x, (64, hid_dim), dtype=jnp.float32)
    out = jax.block_until_ready(
        lambda_legacy_forward(x_big, w_blk_bf16, b_blk, block_b=32))
    ref = _reference(x_big, w_mean, b_mean, w_logvar, b_logvar)
    for o, r in zip(out, ref):
        assert jnp.allclose(o, r, atol=5e-2, rtol=5e-2), "bf16 tiled-batch mismatch"

    print("KERNEL_OK")
</pallas_src>

<mosaic_0001>
module attributes {stable_mosaic.version = 11 : i64} {
  func.func @_lambda_fused_kernel(%arg0: i32, %arg1: memref<4x128xf32, #tpu.memory_space<vmem>>, %arg2: memref<128x128xf32, #tpu.memory_space<vmem>>, %arg3: memref<1x128xf32, #tpu.memory_space<vmem>>, %arg4: memref<4x128xf32, #tpu.memory_space<vmem>>) attributes {dimension_semantics = [#tpu.dimension_semantics<parallel>], iteration_bounds = array<i64: 1>, scalar_prefetch = 0 : i64, scratch_operands = 0 : i64, tpu.core_type = #tpu.core_type<tc>, window_params = [{transform_indices = @transform_0, window_bounds = array<i64: 4, 128>}, {pipeline_mode = #tpu.pipeline_mode<synchronous>, transform_indices = @transform_1, window_bounds = array<i64: 128, 128>}, {pipeline_mode = #tpu.pipeline_mode<synchronous>, transform_indices = @transform_2, window_bounds = array<i64: 1, 128>}, {transform_indices = @transform_3, window_bounds = array<i64: 4, 128>}]} {
    %c0 = arith.constant 0 : index
    %c0_0 = arith.constant 0 : index
    %0 = vector.load %arg1[%c0, %c0_0] : memref<4x128xf32, #tpu.memory_space<vmem>>, vector<4x128xf32>
    %c0_1 = arith.constant 0 : index
    %c0_2 = arith.constant 0 : index
    %1 = vector.load %arg2[%c0_1, %c0_2] : memref<128x128xf32, #tpu.memory_space<vmem>>, vector<128x128xf32>
    %cst = arith.constant dense<0.000000e+00> : vector<4x128xf32>
    %2 = tpu.matmul %0, %1, %cst {dimension_numbers = #tpu.dot_dimension_numbers<[1], [0], [0], [1], [0, 0, 1, 1], [], []>} : vector<4x128xf32>, vector<128x128xf32>, vector<4x128xf32> -> vector<4x128xf32>
    %c0_3 = arith.constant 0 : index
    %c0_4 = arith.constant 0 : index
    %3 = vector.load %arg3[%c0_3, %c0_4] : memref<1x128xf32, #tpu.memory_space<vmem>>, vector<1x128xf32>
    %4 = vector.broadcast %3 : vector<1x128xf32> to vector<4x128xf32>
    %5 = arith.addf %2, %4 : vector<4x128xf32>
    %cst_5 = arith.constant 2.000000e+01 : f32
    %6 = vector.broadcast %cst_5 : f32 to vector<4x128xf32>
    %7 = arith.cmpf ogt, %5, %6 : vector<4x128xf32>
    %cst_6 = arith.constant 2.000000e+01 : f32
    %8 = vector.broadcast %cst_6 : f32 to vector<4x128xf32>
    %9 = arith.minimumf %5, %8 : vector<4x128xf32>
    %10 = math.exp %9 : vector<4x128xf32>
    %11 = math.log1p %10 : vector<4x128xf32>
    %12 = arith.select %7, %5, %11 : vector<4x128xi1>, vector<4x128xf32>
    %13 = tpu.iota {dimensions = array<i32: 1>} : vector<4x128xi32>
    %c64_i32 = arith.constant 64 : i32
    %c0_i32 = arith.constant 0 : i32
    %14 = arith.cmpi eq, %c64_i32, %c0_i32 : i32
    %c1_i32 = arith.constant 1 : i32
    %15 = arith.select %14, %c1_i32, %c64_i32 : i32
    %16 = vector.broadcast %15 : i32 to vector<4x128xi32>
    %17 = arith.remsi %13, %16 : vector<4x128xi32>
    %c0_i32_7 = arith.constant 0 : i32
    %18 = vector.broadcast %c0_i32_7 : i32 to vector<4x128xi32>
    %19 = arith.cmpi ne, %17, %18 : vector<4x128xi32>
    %c0_i32_8 = arith.constant 0 : i32
    %20 = vector.broadcast %c0_i32_8 : i32 to vector<4x128xi32>
    %21 = arith.cmpi slt, %17, %20 : vector<4x128xi32>
    %c0_i32_9 = arith.constant 0 : i32
    %22 = arith.cmpi slt, %15, %c0_i32_9 : i32
    %23 = vector.broadcast %22 : i1 to vector<4x128xi1>
    %24 = vector.broadcast %23 : vector<4x128xi1> to vector<4x128xi1>
    %25 = arith.xori %21, %24 : vector<4x128xi1>
    %26 = arith.andi %25, %19 : vector<4x128xi1>
    %27 = vector.broadcast %15 : i32 to vector<4x128xi32>
    %28 = arith.addi %17, %27 : vector<4x128xi32>
    %29 = arith.select %26, %28, %17 : vector<4x128xi1>, vector<4x128xi32>
    %c32_i32 = arith.constant 32 : i32
    %30 = vector.broadcast %c32_i32 : i32 to vector<4x128xi32>
    %31 = arith.cmpi sge, %29, %30 : vector<4x128xi32>
    %32 = arith.select %31, %12, %5 : vector<4x128xi1>, vector<4x128xf32>
    %c0_10 = arith.constant 0 : index
    %c0_11 = arith.constant 0 : index
    %33 = vector.load %arg4[%c0_10, %c0_11] : memref<4x128xf32, #tpu.memory_space<vmem>>, vector<4x128xf32>
    tpu.vector_store %arg4[%c0_10, %c0_11], %32 {strides = array<i32>} : memref<4x128xf32, #tpu.memory_space<vmem>>, vector<4x128xf32>,
    return
  }
  func.func @transform_0(%arg0: i32) -> (i32, i32) {
    %c0_i32 = arith.constant 0 : i32
    %c0_i32_0 = arith.constant 0 : i32
    return %arg0, %c0_i32 : i32, i32
  }
  func.func @transform_1(%arg0: i32) -> (i32, i32) {
    %c0_i32 = arith.constant 0 : i32
    %c0_i32_0 = arith.constant 0 : i32
    %c0_i32_1 = arith.constant 0 : i32
    return %c0_i32, %c0_i32_0 : i32, i32
  }
  func.func @transform_2(%arg0: i32) -> (i32, i32) {
    %c0_i32 = arith.constant 0 : i32
    %c0_i32_0 = arith.constant 0 : i32
    %c0_i32_1 = arith.constant 0 : i32
    return %c0_i32, %c0_i32_0 : i32, i32
  }
  func.func @transform_3(%arg0: i32) -> (i32, i32) {
    %c0_i32 = arith.constant 0 : i32
    %c0_i32_0 = arith.constant 0 : i32
    return %arg0, %c0_i32 : i32, i32
  }
}

</mosaic_0001>

<bundles_post_ra>
// kernel: tpu_custom_call.1
= control target key start
LH: loop header
LB: loop body
LE: loop exit
PB: predicated region body
PF: predicated region fallthrough
CT: control target
= control target key end

     0   :  { %8 = vsyncpa [#allocation3], 0  ;;  %s260_s0 = inlined_call_operand.hbm [shape: f32[4,128], index: 0, kind: input, shape index: {}]   ;;  %s261_s1 = inlined_call_operand.hbm [shape: f32[128,128], index: 1, kind: input, shape index: {}]   ;;  %s262_s2 = inlined_call_operand.vmem [shape: f32[1,128], index: 2, kind: input, shape index: {}]   ;;  %s263_s3 = inlined_call_operand.hbm [shape: f32[4,128], index: 3, kind: output, shape index: {}]  }
   0x1   :  { %9 = vsyncpa [#allocation6], 0 }
   0x2   :  { %10 = vsyncpa [#allocation4], 0  ;;  %s16_s14 = sshll.u32 %s260_s0, 4  ;;  %s223_s15 = smov [#allocation2]   ;;  %s17_s14 = int_to_ptr.hbm [resolvable:$true] %s16_s14 }
   0x3   :  { %s18_s16 = sshll.u32 %s223_s15, 4  ;;  %s26_s19 = sshll.u32 %s261_s1, 4  ;;  %s19_s16 = int_to_ptr.vmem [resolvable:$true] %s18_s16  ;;  %s27_s19 = int_to_ptr.hbm [resolvable:$true] %s26_s19 }
   0x4   :  { %21 = dma.hbm_to_vmem [thread:$0]  %s17_s14, 64, %s19_s16, [#allocation3]  }
   0x5   :  { %s224_s20 = smov [#allocation5]   ;;  %s225_s22 = smov 128  }
   0x6   :  { %s28_s21 = sshll.u32 %s224_s20, 4  ;;  %s226_s23 = smov 8   ;;  %s29_s21 = int_to_ptr.vmem [resolvable:$true] %s28_s21 }
   0x7   :  { %34 = dma.hbm_to_vmem [thread:$0]  %s27_s19, 2048, %s29_s21, [#allocation6], %s225_s22, %s225_s22, %s226_s23  }
   0x8   :  { %217 = dma.done.wait [#allocation3], 64  }
   0x9   :  { %218 = vsyncadd [#allocation3], 4294967232 }
   0xa   :  { %219 = dma.done.wait [#allocation6], 2048  }
   0xb   :  { %220 = vsyncadd [#allocation6], 4294965248  ;;  %v61_v0 = vld [vmem:[#allocation5 + $0x78] sm:$0xff]  ;;  %v60_v1 = vld [vmem:[#allocation5 + $0x70] sm:$0xff]  ;;  %v100_v22 = vlaneseq  ;;  %s227_s24 = smov [#allocation7]   ;;  %s124_s27 = sshll.u32 %s263_s3, 4  ;;  %s125_s27 = int_to_ptr.hbm [resolvable:$true] %s124_s27 }
   0xc   :  { %66 = vmatpush.msra.mxu0 %v61_v0  ;;  %v59_v2 = vld [vmem:[#allocation5 + $0x68] sm:$0xff]  ;;  %v58_v3 = vld [vmem:[#allocation5 + $0x60] sm:$0xff]  ;;  %v57_v4 = vld [vmem:[#allocation5 + $0x58] sm:$0xff]  ;;  %s122_s25 = sshll.u32 %s227_s24, 4  ;;  %s123_s25 = int_to_ptr.vmem [resolvable:$true] %s122_s25 }
   0xd   :  { %v56_v5 = vld [vmem:[#allocation5 + $0x50] sm:$0xff]  ;;  %v55_v6 = vld [vmem:[#allocation5 + $0x48] sm:$0xff]  ;;  %v54_v7 = vld [vmem:[#allocation5 + $0x40] sm:$0xff]  ;;  %v101_v26 = vand.u32 127, %v100_v22 }
   0xe   :  { %67 = vmatpush.msra.mxu0 %v60_v1  ;;  %v53_v8 = vld [vmem:[#allocation5 + $0x38] sm:$0xff]  ;;  %v52_v9 = vld [vmem:[#allocation5 + $0x30] sm:$0xff]  ;;  %v51_v10 = vld [vmem:[#allocation5 + $0x28] sm:$0xff] }
   0xf   :  { %v50_v11 = vld [vmem:[#allocation5 + $0x20] sm:$0xff]  ;;  %v49_v12 = vld [vmem:[#allocation5 + $0x18] sm:$0xff]  ;;  %v48_v13 = vld [vmem:[#allocation5 + $0x10] sm:$0xff]  ;;  %v106_v29 = vand.u32 63, %v101_v26 }
  0x10   :  { %68 = vmatpush.msra.mxu0 %v59_v2  ;;  %v47_v14 = vld [vmem:[#allocation5 + $0x8] sm:$0xff]  ;;  %v46_v15 = vld [vmem:[#allocation5] sm:$0xff]  ;;  %v45_v16 = vld [vmem:[#allocation2] sm:$0xf] }
  0x11   :  { %v140_v17 = vld [vmem:[%s262_s2] ss:$0 sm:$0xff]  ;;  %vm114_vm1 = vcmp.ge.s32.totalorder %v106_v29, 32 }
  0x12   :  { %69 = vmatpush.msra.mxu0 %v58_v3 }
  0x14   :  { %70 = vmatpush.msra.mxu0 %v57_v4 }
  0x16   :  { %71 = vmatpush.msra.mxu0 %v56_v5 }
  0x18   :  { %72 = vmatpush.msra.mxu0 %v55_v6 }
  0x1a   :  { %73 = vmatpush.msra.mxu0 %v54_v7 }
  0x1c   :  { %74 = vmatpush.msra.mxu0 %v53_v8 }
  0x1e   :  { %75 = vmatpush.msra.mxu0 %v52_v9 }
  0x20   :  { %76 = vmatpush.msra.mxu0 %v51_v10 }
  0x22   :  { %77 = vmatpush.msra.mxu0 %v50_v11 }
  0x24   :  { %78 = vmatpush.msra.mxu0 %v49_v12 }
  0x26   :  { %79 = vmatpush.msra.mxu0 %v48_v13 }
  0x28   :  { %80 = vmatpush.msra.mxu0 %v47_v14 }
  0x2a   :  { %81 = vmatpush.msra.mxu0 %v46_v15 }
  0x2b   :  { %82 = vmatmul.f32.vlgmr.msra.gmra.mxu0 %v45_v16 }
  0xa8   :  { %v83_v18 = vpop.f32.mrf.mxu0 }
  0xa9   :  { %v84_v19 = vadd.f32 %v140_v17, %v83_v18 }
  0xab   :  { %v87_v20 = vmin.f32 %v84_v19, 20.0  ;;  %vm86_vm2 = vcmp.gt.f32.partialorder %v84_v19, 20.0 }
  0xad   :  { %v88_v21 = vmul.f32 1.442695, %v87_v20 }
  0xaf   :  { %141 = vpow2.f32 %v88_v21 }
  0xb5   :  { %v142_v23 = vpop.eup %141 }
  0xb6   :  { %v90_v24 = vadd.f32 1.0, %v142_v23  ;;  %v93_v25 = vmul.f32 -0.5, %v142_v23  ;;  %v96_v28 = vand.u32 2147483647, %v142_v23 }
  0xb8   :  { %143 = vlog2.f32 %v90_v24  ;;  %v94_v27 = vadd.f32 1.0, %v93_v25  ;;  %vm97_vm0 = vcmp.lt.f32.partialorder %v96_v28, 0.0004427343 }
  0xba   :  { %v95_v32 = vmul.f32 %v142_v23, %v94_v27 }
  0xbe   :  { %v144_v30 = vpop.eup %143 }
  0xbf   :  { %v92_v31 = vmul.f32 0.6931472, %v144_v30 }
  0xc1   :  { %v98_v33 = vsel %vm97_vm0, %v95_v32, %v92_v31 }
  0xc2   :  { %v99_v34 = vsel %vm86_vm2, %v84_v19, %v98_v33 }
  0xc3   :  { %v115_v35 = vsel %vm114_vm1, %v99_v34, %v84_v19 }
  0xc4   :  { %116 = vst [vmem:[#allocation7] sm:$0xf] %v115_v35 }
  0xc5   :  { %127 = dma.vmem_to_hbm [thread:$0]  %s123_s25, 64, %s125_s27, [#allocation4]  }
  0xc6   :  { %221 = dma.done.wait [#allocation4], 64  }
  0xc7   :  { %222 = vsyncadd [#allocation4], 4294967232 }
  0xc8   :  { %132 = vsyncpa [#allocation3], 1 }
  0xc9   :  { %133 = vsyncpa [#allocation6], 1 }
  0xca   :  { %134 = vsyncpa [#allocation4], 1 }

</bundles_post_ra>
